<compile_context>
chip_gen: v7x
topology: tpu7x:2x2x1
jax: 0.10.0
libtpu: 0.0.40
codegen_flags: <defaults>
</compile_context>

<pallas_src>
import numpy as np
import jax
import jax.numpy as jnp
from jax.experimental import pallas as pl
from jax.experimental.pallas import tpu as pltpu

_R = 64      # hidden width of mlp_pre_pool (fixed by the module: [E+2H, 64, H])
_HP = 128    # padded lane width of the layer-2 / pooled output


def _make_kernel(N, H):
    # Static row offsets inside the packed weight slab.
    o_wcat = 0            # (H, 128)  : [whj | whi]
    o_w2 = H              # (64, 128) : w2 zero-padded to 128 output lanes
    o_wc = H + _R         # (2, 128)  : folded spatial-embedding weight (lanes 0:64)
    o_b1 = H + _R + 2     # (1, 128)  : folded layer-1 bias            (lanes 0:64)
    o_b2 = H + _R + 3     # (1, 128)  : layer-2 bias zero-padded

    def kernel(corr_ref, h_ref, mask_ref, w_ref, out_ref):
        # One merged 128-lane MXU matmul: lanes 0:64 = lstm@whj, 64:128 = lstm@whi.
        a = jnp.dot(h_ref[...], w_ref[o_wcat:o_wcat + H, :],
                    preferred_element_type=jnp.float32)            # (N, 128)
        a_j = a[:, :_R]                                            # (N, 64)
        a_i = a[:, _R:]                                            # (N, 64)

        # Spatial embedding folded into layer 1; K=2 -> two VPU FMAs, MXU stays free.
        corr = corr_ref[...]                                       # (N*N, 2)
        corr_c = (corr[:, 0:1] * w_ref[o_wc:o_wc + 1, :_R]
                  + corr[:, 1:2] * w_ref[o_wc + 1:o_wc + 2, :_R]
                  + w_ref[o_b1:o_b1 + 1, :_R])                     # (N*N, 64)

        # pre[i, j] = corr[i,j]@Wc + lstm[j]@Whj + lstm[i]@Whi + b1'
        pre = corr_c.reshape(N, N, _R) + a_j[None, :, :] + a_i[:, None, :]
        x = jnp.maximum(pre, 0.0).reshape(N * N, _R)

        # Layer 2 (output lanes padded to 128 -> full-lane epilogue & store) + ReLU.
        x = jnp.dot(x, w_ref[o_w2:o_w2 + _R, :],
                    preferred_element_type=jnp.float32) + w_ref[o_b2:o_b2 + 1, :]
        x = jnp.maximum(x, 0.0).reshape(N, N, _HP)

        # Mask-multiply is exact here because x >= 0 after the final ReLU:
        # non-neighbours contribute 0 and an all-masked row maxes to 0, matching
        # the reference's -inf -> 0 rule.
        pool = jnp.max(x * mask_ref[...][:, :, None], axis=1)      # (N, 128)
        out_ref[...] = pool

    return kernel


def _pack_weights(params, H):
    """Fold spatial embedding + concat into layer 1 and pack all parameters into
    one lane-dense (rows, 128) f32 slab (a single parameter DMA)."""
    E = params["wse"].shape[1]
    w1 = params["w1"]                                        # (E+2H, 64)
    assert w1.shape == (E + 2 * H, _R)
    assert H <= _HP and 2 * _R == _HP

    wc = params["wse"] @ w1[:E]                              # (2, 64)
    b1f = params["bse"] @ w1[:E] + params["b1"]              # (1, 64)
    w_cat = jnp.concatenate([w1[E:E + H], w1[E + H:]], 1)    # (H, 128) = [whj|whi]

    w2p = jnp.zeros((_R, _HP), jnp.float32).at[:, :H].set(params["w2"])
    b2p = jnp.zeros((1, _HP), jnp.float32).at[:, :H].set(params["b2"])
    wcp = jnp.zeros((2, _HP), jnp.float32).at[:, :_R].set(wc)
    b1p = jnp.zeros((1, _HP), jnp.float32).at[:, :_R].set(b1f)

    rows = H + _R + 4
    rows_pad = ((rows + 7) // 8) * 8                         # keep sublane-aligned
    slab = jnp.zeros((rows_pad, _HP), jnp.float32)
    slab = slab.at[0:H].set(w_cat.astype(jnp.float32))
    slab = slab.at[H:H + _R].set(w2p)
    slab = slab.at[H + _R:H + _R + 2].set(wcp)
    slab = slab.at[H + _R + 2:H + _R + 3].set(b1p)
    slab = slab.at[H + _R + 3:H + _R + 4].set(b2p)
    return slab


def pooling_net_forward(corr_index, nei_index, lstm_state, params):
    """pool_h for a single scene ((N,N,2), (N,N), (N,H)) or a batch of scenes
    ((B,N,N,2), (B,N,N), (B,N,H)). Batching timesteps/scenes into one call is
    the dominant perf lever for this tiny per-scene workload."""
    single = corr_index.ndim == 3
    if single:
        corr_index, nei_index, lstm_state = (
            corr_index[None], nei_index[None], lstm_state[None])
    B, N = corr_index.shape[0], corr_index.shape[1]
    H = lstm_state.shape[-1]

    slab = _pack_weights(params, H)
    corr_flat = corr_index.reshape(B, N * N, 2).astype(jnp.float32)
    mask = (nei_index > 0).astype(jnp.float32)               # (B, N, N)
    lstm = lstm_state.astype(jnp.float32)
    # TODO(synk): optionally cast corr/lstm/slab to bf16 (keep f32 epilogue) on
    # v6e/v7x once the batch makes the matmuls non-trivial.

    grid_spec = pltpu.PrefetchScalarGridSpec(
        num_scalar_prefetch=0,
        grid=(B,),
        in_specs=[
            pl.BlockSpec((None, N * N, 2), lambda b: (b, 0, 0)),   # pair offsets
            pl.BlockSpec((None, N, H), lambda b: (b, 0, 0)),       # lstm_state
            pl.BlockSpec((None, N, N), lambda b: (b, 0, 0)),       # neighbour mask
            pl.BlockSpec(slab.shape, lambda b: (0, 0)),            # packed weights
        ],
        out_specs=pl.BlockSpec((None, N, _HP), lambda b: (b, 0, 0)),
    )

    out = pl.pallas_call(
        _make_kernel(N, H),
        out_shape=jax.ShapeDtypeStruct((B, N, _HP), jnp.float32),
        grid_spec=grid_spec,
        compiler_params=pltpu.CompilerParams(
            dimension_semantics=("parallel",)),   # batch axis -> both TCs on v7x
    )(corr_flat, lstm, mask, slab)

    out = out[..., :H]                            # drop lane padding
    return out[0] if single else out


def init_params(key, embedding_dim=32, h_dim=32):
    """Deterministic synthetic weights, PyTorch-Linear-style uniform init.
    Weights are stored as (fan_in, fan_out) == W.T of torch.nn.Linear."""
    mlp_pre_dim = embedding_dim + 2 * h_dim
    k = jax.random.split(key, 6)

    def lin(kw, kb, fan_in, fan_out):
        bound = 1.0 / np.sqrt(fan_in)
        w = jax.random.uniform(kw, (fan_in, fan_out), jnp.float32, -bound, bound)
        b = jax.random.uniform(kb, (1, fan_out), jnp.float32, -bound, bound)
        return w, b

    wse, bse = lin(k[0], k[1], 2, embedding_dim)
    w1, b1 = lin(k[2], k[3], mlp_pre_dim, 64)
    w2, b2 = lin(k[4], k[5], 64, h_dim)
    return dict(wse=wse, bse=bse, w1=w1, b1=b1, w2=w2, b2=b2)


def pooling_net_reference(corr_index, nei_index, lstm_state, params):
    """Pure-JAX reference mirroring the PyTorch forward (dense + -inf mask)."""
    N = corr_index.shape[0]
    H = lstm_state.shape[1]
    corr_flat = corr_index.reshape(N * N, 2)
    hj = jnp.broadcast_to(lstm_state[None, :, :], (N, N, H)).reshape(N * N, H)
    hi = jnp.broadcast_to(lstm_state[:, None, :], (N, N, H)).reshape(N * N, H)
    r = corr_flat @ params["wse"] + params["bse"]
    x = jnp.concatenate([r, hj, hi], axis=1)
    x = jnp.maximum(x @ params["w1"] + params["b1"], 0.0)
    x = jnp.maximum(x @ params["w2"] + params["b2"], 0.0)
    m = nei_index.reshape(N * N, 1) > 0
    h_full = jnp.where(m, x, -jnp.inf)
    pool = h_full.reshape(N, N, H).max(axis=1)
    return jnp.where(jnp.isinf(pool), 0.0, pool)


if __name__ == "__main__":
    key = jax.random.PRNGKey(0)
    kp, kc, kl, kn, kcb, klb, knb = jax.random.split(key, 7)

    N, E, Hd, B = 8, 32, 32, 4   # agents, embedding_dim, h_dim, batched scenes
    params = init_params(kp, embedding_dim=E, h_dim=Hd)

    # --- single scene ---
    corr_index = jax.random.normal(kc, (N, N, 2), dtype=jnp.float32)
    lstm_state = jax.random.normal(kl, (N, Hd), dtype=jnp.float32)
    nei_index = (jax.random.uniform(kn, (N, N)) > 0.4).astype(jnp.float32)
    nei_index = nei_index.at[0].set(0.0)   # agent 0 has no neighbours -> zero row

    out = jax.block_until_ready(
        pooling_net_forward(corr_index, nei_index, lstm_state, params))
    ref = pooling_net_reference(corr_index, nei_index, lstm_state, params)
    # 1e-2 covers default-precision (bf16-pass) matmul differences between the
    # folded kernel and the unfolded XLA reference while still catching any
    # indexing/broadcast bug (those produce O(1) errors).
    np.testing.assert_allclose(np.asarray(out), np.asarray(ref),
                               rtol=1e-2, atol=1e-2)

    # --- batched scenes: one pallas_call covering B timesteps ---
    corr_b = jax.random.normal(kcb, (B, N, N, 2), dtype=jnp.float32)
    lstm_b = jax.random.normal(klb, (B, N, Hd), dtype=jnp.float32)
    nei_b = (jax.random.uniform(knb, (B, N, N)) > 0.4).astype(jnp.float32)
    nei_b = nei_b.at[:, 0].set(0.0)

    out_b = jax.block_until_ready(
        pooling_net_forward(corr_b, nei_b, lstm_b, params))
    ref_b = jnp.stack([
        pooling_net_reference(corr_b[i], nei_b[i], lstm_b[i], params)
        for i in range(B)])
    np.testing.assert_allclose(np.asarray(out_b), np.asarray(ref_b),
                               rtol=1e-2, atol=1e-2)

    print("KERNEL_OK")
</pallas_src>

<mosaic_0001>
module attributes {stable_mosaic.version = 11 : i64} {
  func.func @kernel(%arg0: i32, %arg1: memref<1x64x2xf32, #tpu.memory_space<vmem>>, %arg2: memref<1x8x32xf32, #tpu.memory_space<vmem>>, %arg3: memref<1x8x8xf32, #tpu.memory_space<vmem>>, %arg4: memref<104x128xf32, #tpu.memory_space<vmem>>, %arg5: memref<1x8x128xf32, #tpu.memory_space<vmem>>) attributes {dimension_semantics = [#tpu.dimension_semantics<parallel>], iteration_bounds = array<i64: 1>, scalar_prefetch = 0 : i64, scratch_operands = 0 : i64, tpu.core_type = #tpu.core_type<tc>, window_params = [{transform_indices = @transform_0, window_bounds = array<i64: 1, 64, 2>}, {transform_indices = @transform_1, window_bounds = array<i64: 1, 8, 32>}, {transform_indices = @transform_2, window_bounds = array<i64: 1, 8, 8>}, {pipeline_mode = #tpu.pipeline_mode<synchronous>, transform_indices = @transform_3, window_bounds = array<i64: 104, 128>}, {transform_indices = @transform_4, window_bounds = array<i64: 1, 8, 128>}]} {
    %c0 = arith.constant 0 : index
    %c0_0 = arith.constant 0 : index
    %c0_1 = arith.constant 0 : index
    %0 = vector.load %arg2[%c0, %c0_0, %c0_1] : memref<1x8x32xf32, #tpu.memory_space<vmem>>, vector<1x8x32xf32>
    %1 = vector.shape_cast %0 : vector<1x8x32xf32> to vector<8x32xf32>
    %c0_2 = arith.constant 0 : index
    %c0_3 = arith.constant 0 : index
    %2 = vector.load %arg4[%c0_2, %c0_3] : memref<104x128xf32, #tpu.memory_space<vmem>>, vector<32x128xf32>
    %cst = arith.constant dense<0.000000e+00> : vector<8x128xf32>
    %3 = tpu.matmul %1, %2, %cst {dimension_numbers = #tpu.dot_dimension_numbers<[1], [0], [0], [1], [0, 0, 1, 1], [], []>} : vector<8x32xf32>, vector<32x128xf32>, vector<8x128xf32> -> vector<8x128xf32>
    %4 = vector.extract_strided_slice %3 {offsets = [0, 0], sizes = [8, 64], strides = [1, 1]} : vector<8x128xf32> to vector<8x64xf32>
    %5 = vector.extract_strided_slice %3 {offsets = [0, 64], sizes = [8, 64], strides = [1, 1]} : vector<8x128xf32> to vector<8x64xf32>
    %c0_4 = arith.constant 0 : index
    %c0_5 = arith.constant 0 : index
    %c0_6 = arith.constant 0 : index
    %6 = vector.load %arg1[%c0_4, %c0_5, %c0_6] : memref<1x64x2xf32, #tpu.memory_space<vmem>>, vector<1x64x2xf32>
    %7 = vector.shape_cast %6 : vector<1x64x2xf32> to vector<64x2xf32>
    %8 = vector.extract_strided_slice %7 {offsets = [0, 0], sizes = [64, 1], strides = [1, 1]} : vector<64x2xf32> to vector<64x1xf32>
    %c96 = arith.constant 96 : index
    %c0_7 = arith.constant 0 : index
    %9 = vector.load %arg4[%c96, %c0_7] : memref<104x128xf32, #tpu.memory_space<vmem>>, vector<1x64xf32>
    %10 = vector.broadcast %8 : vector<64x1xf32> to vector<64x64xf32>
    %11 = vector.broadcast %9 : vector<1x64xf32> to vector<64x64xf32>
    %12 = arith.mulf %10, %11 : vector<64x64xf32>
    %13 = vector.extract_strided_slice %7 {offsets = [0, 1], sizes = [64, 1], strides = [1, 1]} : vector<64x2xf32> to vector<64x1xf32>
    %c97 = arith.constant 97 : index
    %c0_8 = arith.constant 0 : index
    %14 = vector.load %arg4[%c97, %c0_8] : memref<104x128xf32, #tpu.memory_space<vmem>>, vector<1x64xf32>
    %15 = vector.broadcast %13 : vector<64x1xf32> to vector<64x64xf32>
    %16 = vector.broadcast %14 : vector<1x64xf32> to vector<64x64xf32>
    %17 = arith.mulf %15, %16 : vector<64x64xf32>
    %18 = arith.addf %12, %17 : vector<64x64xf32>
    %c98 = arith.constant 98 : index
    %c0_9 = arith.constant 0 : index
    %19 = vector.load %arg4[%c98, %c0_9] : memref<104x128xf32, #tpu.memory_space<vmem>>, vector<1x64xf32>
    %20 = vector.broadcast %19 : vector<1x64xf32> to vector<64x64xf32>
    %21 = arith.addf %18, %20 : vector<64x64xf32>
    %22 = vector.shape_cast %21 : vector<64x64xf32> to vector<8x8x64xf32>
    %23 = vector.shape_cast %4 : vector<8x64xf32> to vector<1x8x64xf32>
    %24 = vector.broadcast %23 : vector<1x8x64xf32> to vector<8x8x64xf32>
    %25 = arith.addf %22, %24 : vector<8x8x64xf32>
    %26 = vector.shape_cast %5 : vector<8x64xf32> to vector<8x1x64xf32>
    %27 = vector.broadcast %26 : vector<8x1x64xf32> to vector<8x8x64xf32>
    %28 = arith.addf %25, %27 : vector<8x8x64xf32>
    %cst_10 = arith.constant 0.000000e+00 : f32
    %29 = vector.broadcast %cst_10 : f32 to vector<8x8x64xf32>
    %30 = arith.maximumf %28, %29 : vector<8x8x64xf32>
    %31 = vector.shape_cast %30 : vector<8x8x64xf32> to vector<64x64xf32>
    %c32 = arith.constant 32 : index
    %c0_11 = arith.constant 0 : index
    %32 = vector.load %arg4[%c32, %c0_11] : memref<104x128xf32, #tpu.memory_space<vmem>>, vector<64x128xf32>
    %cst_12 = arith.constant dense<0.000000e+00> : vector<64x128xf32>
    %33 = tpu.matmul %31, %32, %cst_12 {dimension_numbers = #tpu.dot_dimension_numbers<[1], [0], [0], [1], [0, 0, 1, 1], [], []>} : vector<64x64xf32>, vector<64x128xf32>, vector<64x128xf32> -> vector<64x128xf32>
    %c99 = arith.constant 99 : index
    %c0_13 = arith.constant 0 : index
    %34 = vector.load %arg4[%c99, %c0_13] : memref<104x128xf32, #tpu.memory_space<vmem>>, vector<1x128xf32>
    %35 = vector.broadcast %34 : vector<1x128xf32> to vector<64x128xf32>
    %36 = arith.addf %33, %35 : vector<64x128xf32>
    %cst_14 = arith.constant 0.000000e+00 : f32
    %37 = vector.broadcast %cst_14 : f32 to vector<64x128xf32>
    %38 = arith.maximumf %36, %37 : vector<64x128xf32>
    %39 = vector.shape_cast %38 : vector<64x128xf32> to vector<8x8x128xf32>
    %c0_15 = arith.constant 0 : index
    %c0_16 = arith.constant 0 : index
    %c0_17 = arith.constant 0 : index
    %40 = vector.load %arg3[%c0_15, %c0_16, %c0_17] : memref<1x8x8xf32, #tpu.memory_space<vmem>>, vector<1x8x8xf32>
    %41 = vector.shape_cast %40 : vector<1x8x8xf32> to vector<8x8xf32>
    %42 = vector.shape_cast %41 : vector<8x8xf32> to vector<8x8x1xf32>
    %43 = vector.broadcast %42 : vector<8x8x1xf32> to vector<8x8x128xf32>
    %44 = arith.mulf %39, %43 : vector<8x8x128xf32>
    %cst_18 = arith.constant dense<0xFF800000> : vector<8x128xf32>
    %45 = vector.multi_reduction <maximumf>, %44, %cst_18 [1] : vector<8x8x128xf32> to vector<8x128xf32>
    %c0_19 = arith.constant 0 : index
    %c0_20 = arith.constant 0 : index
    %c0_21 = arith.constant 0 : index
    %46 = vector.load %arg5[%c0_19, %c0_20, %c0_21] : memref<1x8x128xf32, #tpu.memory_space<vmem>>, vector<1x8x128xf32>
    %47 = vector.shape_cast %46 : vector<1x8x128xf32> to vector<8x128xf32>
    %48 = vector.shape_cast %45 : vector<8x128xf32> to vector<1x8x128xf32>
    tpu.vector_store %arg5[%c0_19, %c0_20, %c0_21], %48 {strides = array<i32>} : memref<1x8x128xf32, #tpu.memory_space<vmem>>, vector<1x8x128xf32>,
    return
  }
  func.func @transform_0(%arg0: i32) -> (i32, i32, i32) {
    %c0_i32 = arith.constant 0 : i32
    %c0_i32_0 = arith.constant 0 : i32
    %c0_i32_1 = arith.constant 0 : i32
    return %arg0, %c0_i32, %c0_i32_0 : i32, i32, i32
  }
  func.func @transform_1(%arg0: i32) -> (i32, i32, i32) {
    %c0_i32 = arith.constant 0 : i32
    %c0_i32_0 = arith.constant 0 : i32
    %c0_i32_1 = arith.constant 0 : i32
    return %arg0, %c0_i32, %c0_i32_0 : i32, i32, i32
  }
  func.func @transform_2(%arg0: i32) -> (i32, i32, i32) {
    %c0_i32 = arith.constant 0 : i32
    %c0_i32_0 = arith.constant 0 : i32
    %c0_i32_1 = arith.constant 0 : i32
    return %arg0, %c0_i32, %c0_i32_0 : i32, i32, i32
  }
  func.func @transform_3(%arg0: i32) -> (i32, i32) {
    %c0_i32 = arith.constant 0 : i32
    %c0_i32_0 = arith.constant 0 : i32
    %c0_i32_1 = arith.constant 0 : i32
    return %c0_i32, %c0_i32_0 : i32, i32
  }
  func.func @transform_4(%arg0: i32) -> (i32, i32, i32) {
    %c0_i32 = arith.constant 0 : i32
    %c0_i32_0 = arith.constant 0 : i32
    %c0_i32_1 = arith.constant 0 : i32
    return %arg0, %c0_i32, %c0_i32_0 : i32, i32, i32
  }
}

</mosaic_0001>

<bundles_post_ra>
// kernel: tpu_custom_call.1
= control target key start
LH: loop header
LB: loop body
LE: loop exit
PB: predicated region body
PF: predicated region fallthrough
CT: control target
= control target key end

     0   :  { %9 = vsyncpa [#allocation3], 0  ;;  %s963_s0 = inlined_call_operand.vmem [shape: f32[1,64,2], index: 0, kind: input, shape index: {}]   ;;  %s964_s1 = inlined_call_operand.vmem [shape: f32[1,8,32], index: 1, kind: input, shape index: {}]   ;;  %s965_s2 = inlined_call_operand.vmem [shape: f32[1,8,8], index: 2, kind: input, shape index: {}]   ;;  %s966_s3 = inlined_call_operand.hbm [shape: f32[104,128], index: 3, kind: input, shape index: {}]   ;;  %s967_s4 = inlined_call_operand.hbm [shape: f32[1,8,128], index: 4, kind: output, shape index: {}]  }
   0x1   :  { %10 = vsyncpa [#allocation4], 0  ;;  %s840_s15 = smov [#allocation2]   ;;  %s792_s19 = scalar_lea.hbm %s966_s3, 1664 }
   0x2   :  { %s22_s16 = sshll.u32 %s840_s15, 4  ;;  %p793_p0 = scmp.ne.s32.totalorder %s966_s3, %s792_s19  ;;  %s23_s16 = int_to_ptr.vmem [resolvable:$true] %s22_s16 }
   0x3   :  { %p796_p1 = scmp.lt.u32.totalorder %s792_s19, %s966_s3 }
   0x5   :  { %p798_p2 = pnand %p796_p1, %p793_p0 }
   0x7   :  { %801 = shalt.err (!%p798_p2)
}
   0x8   :  { %s802_s24 = scalar_lea.vmem %s23_s16, 1664  ;;  %p807_p4 = scmp.lt.s32.totalorder %s23_s16, %s23_s16 }
   0x9   :  { %p803_p3 = scmp.ne.s32.totalorder %s23_s16, %s802_s24  ;;  %p808_p5 = scmp.lt.s32.totalorder %s802_s24, %s802_s24 }
   0xb   :  { %p809_p6 = por %p808_p5, %p807_p4 }
   0xd   :  { %p810_p7 = pnand %p809_p6, %p803_p3 }
   0xf   :  { %813 = shalt.err (!%p810_p7)
}
  0x10   :  { %s841_s25 = smov 128   ;;  %s842_s26 = smov 8  }
  0x11   :  { %28 = dma.hbm_to_vmem [thread:$0]  %s966_s3, 1664, %s23_s16, [#allocation3], %s841_s25, %s841_s25, %s842_s26  }
  0x12   :  { %836 = dma.done.wait [#allocation3], 1664  }
  0x13   :  { %837 = vsyncadd [#allocation3], 4294965632  ;;  %v843_v0 = vmov 0.0|0.0   ;;  %vm844_vm0 = vmmov 0   ;;  %v845_v1 = vmov 0.0   ;;  %v846_v2 = vmov 0  }
  0x14   :  { %744 = vmatprep.subr.bf16.mxu0 %v843_v0  ;;  %713 = vmatprep.mubr.msk.f32.mxu0 %vm844_vm0, %v845_v1  ;;  %v847_v3 = vmov 1   ;;  %v33_v4 = vld [vmem:[#allocation2] sm:$0xff]  ;;  %v34_v5 = vld [vmem:[#allocation2 + $0x8] sm:$0xff]  ;;  %v35_v6 = vld [vmem:[#allocation2 + $0x10] sm:$0xff]  ;;  %vm37_vm1 = vcmask 261120   ;;  %v251_v30 = vlaneseq  ;;  %vm381_vm2 = vcmask 523264  }
  0x15   :  { %786 = vset.pattern.permute.xlu1 %v846_v2  ;;  %785 = vset.pattern.permute.xlu0 %v847_v3  ;;  %v745_v7 = vpack.c.bf16 %v34_v5, %v33_v4  ;;  %v36_v8 = vld [vmem:[#allocation2 + $0x18] sm:$0xff]  ;;  %v114_v9 = vld [vmem:[%s963_s0 + $0x18] sm:$0xff]  ;;  %v113_v10 = vld [vmem:[%s963_s0 + $0x10] sm:$0xff]  ;;  %v848_v28 = vmov 1966171168   ;;  %vm640_vm3 = vcmask 1041409  }
  0x16   :  { %137 = vperm.xlu1 %786, %v114_v9   ;;  %v748_v11 = vpack.c.bf16 %v36_v8, %v35_v6  ;;  %182 = vperm.xlu0 %785, %v113_v10   ;;  %v32_v12 = vld [vmem:[%s964_s1] sm:$0xff]  ;;  %v112_v14 = vld [vmem:[%s963_s0 + $0x8] sm:$0xff]  ;;  %v117_v17 = vld [vmem:[%s963_s0 + $0x30] sm:$0xff]  ;;  %v249_v29 = vunpack.c.l.s4 %v848_v28  ;;  %v915_v32 = vshrl.u32 %v251_v30, 7  ;;  %vm642_vm4 = vcmask 1042434  }
  0x17   :  { %746 = vmatpush3.bf16.msra.mxu0 %v745_v7  ;;  %v111_v13 = vld [vmem:[%s963_s0] sm:$0xff]  ;;  %v116_v16 = vld [vmem:[%s963_s0 + $0x28] sm:$0xff]  ;;  %v118_v18 = vld [vmem:[%s963_s0 + $0x38] sm:$0xff]  ;;  %vm644_vm5 = vcmask 1043459   ;;  %vm646_vm6 = vcmask 1044484   ;;  %vm648_vm7 = vcmask 1045509  }
  0x18   :  { %747 = vmatprep.subr.bf16.mxu0 %v843_v0  ;;  %v115_v15 = vld [vmem:[%s963_s0 + $0x20] sm:$0xff]  ;;  %v368_v19 = vld [vmem:[#allocation2 + $0x20] sm:$0xff]  ;;  %v369_v20 = vld [vmem:[#allocation2 + $0x28] sm:$0xff]  ;;  %v250_v31 = vunpack.c.0.s8 %v249_v29  ;;  %v298_v40 = vsub.s32 0, %v915_v32  ;;  %s849_s0 = smov 64   ;;  %v529_v61 = vsub.s32 1, %v915_v32 }
  0x19   :  { %v370_v21 = vld [vmem:[#allocation2 + $0x30] sm:$0xff]  ;;  %v750_v22 = vpack.c.bf16 %v369_v20, %v368_v19  ;;  %v371_v23 = vld [vmem:[#allocation2 + $0x38] sm:$0xff]  ;;  %v372_v25 = vld [vmem:[#allocation2 + $0x40] sm:$0xff]  ;;  %v536_v0 = vsub.s32 2, %v915_v32  ;;  %v550_v4 = vsub.s32 4, %v915_v32  ;;  %v557_v6 = vsub.s32 5, %v915_v32 }
  0x1a   :  { %787 = vset.pattern.permute.xlu1 %v847_v3  ;;  %174 = vperm.xlu0 %785, %v111_v13   ;;  %v754_v24 = vpack.c.bf16 %v371_v23, %v370_v21  ;;  %v373_v26 = vld [vmem:[#allocation2 + $0x48] sm:$0xff]  ;;  %v374_v33 = vld [vmem:[#allocation2 + $0x50] sm:$0xff]  ;;  %v375_v34 = vld [vmem:[#allocation2 + $0x58] sm:$0xff]  ;;  %v253_v36 = vsub.s32 %v250_v31, %v915_v32  ;;  %v564_v8 = vsub.s32 6, %v915_v32  ;;  %vm650_vm8 = vcmask 1046534  }
  0x1b   :  { %749 = vmatpush3.bf16.msra.mxu0 %v748_v11  ;;  %186 = vperm.xlu1 %787, %v114_v9   ;;  %v758_v27 = vpack.c.bf16 %v373_v26, %v372_v25  ;;  %v762_v35 = vpack.c.bf16 %v375_v34, %v374_v33  ;;  %v519_v59 = vld [vmem:[%s965_s2] sm:$0xff]  ;;  %v672_v23 = vld [vmem:[#allocation2 + $0x60] ss:$0 sm:$0xff]  ;;  %s850_s2 = smov [#allocation5]   ;;  %vm652_vm9 = vcmask 1047559  }
  0x1c   :  { %751 = vmatprep.subr.bf16.mxu0 %v750_v22  ;;  %766 = vmatprep.subr.bf16.mxu1 %v750_v22  ;;  %v523_v63 = vrot.slane %v519_v59, %v298_v40  ;;  %v530_v1 = vrot.slane %v519_v59, %v529_v61  ;;  %v551_v7 = vrot.slane %v519_v59, %v550_v4  ;;  %s662_s21 = sshll.u32 %s850_s2, 4  ;;  %s663_s21 = int_to_ptr.vmem [resolvable:$true] %s662_s21 }
  0x1d   :  { %770 = vmatpush3.bf16.msra.mxu1 %v750_v22  ;;  %v558_v9 = vrot.slane %v519_v59, %v557_v6  ;;  %v565_v11 = vrot.slane %v519_v59, %v564_v8  ;;  %s814_s22 = scalar_lea.vmem %s663_s21, 128  ;;  %p819_p9 = scmp.lt.s32.totalorder %s663_s21, %s663_s21 }
  0x1e   :  { %714 = vmatmul.mubr.msk.f32.vlgmr.msra.gmra.mrb[0].mxu0 %vm37_vm1, %v32_v12  ;;  %789 = vset.pattern.permute.xlu0 %v846_v2  ;;  %p815_p8 = scmp.ne.s32.totalorder %s663_s21, %s814_s22  ;;  %p820_p10 = scmp.lt.s32.totalorder %s814_s22, %s814_s22 }
  0x1f   :  { %788 = vset.pattern.permute.xlu1 %v846_v2  ;;  %132 = vperm.xlu0 %789, %v113_v10   ;;  %v543_v2 = vsub.s32 3, %v915_v32  ;;  %v571_v10 = vsub.s32 7, %v915_v32 }
  0x20   :  { %122 = vperm.xlu1 %788, %v111_v13   ;;  %753 = vmatpush3.bf16.msra.mxu0 %v750_v22  ;;  %p821_p11 = por %p820_p10, %p819_p9 }
  0x21   :  { %755 = vmatprep.subr.bf16.mxu0 %v754_v24  ;;  %767 = vmatprep.subr.bf16.mxu1 %v754_v24  ;;  %v544_v5 = vrot.slane %v519_v59, %v543_v2  ;;  %v572_v12 = vrot.slane %v519_v59, %v571_v10 }
  0x22   :  { %771 = vmatpush3.bf16.msra.mxu1 %v754_v24  ;;  %p822_p12 = pnand %p821_p11, %p815_p8 }
  0x23   :  { %142 = vperm.xlu0 %789, %v115_v15   ;;  %768 = vmatprep.subr.bf16.mxu1 %v758_v27 }
  0x24   :  { %127 = vperm.xlu1 %788, %v112_v14   ;;  %757 = vmatpush3.bf16.msra.mxu0 %v754_v24  ;;  %v673_v24 = vld [vmem:[#allocation2 + $0x61] ss:$0 sm:$0xff] }
  0x25   :  { %759 = vmatprep.subr.bf16.mxu0 %v758_v27 }
  0x26   :  { %772 = vmatpush3.bf16.msra.mxu1 %v758_v27 }
  0x27   :  { %147 = vperm.xlu0 %789, %v116_v16   ;;  %769 = vmatprep.subr.bf16.mxu1 %v762_v35 }
  0x28   :  { %790 = vset.pattern.permute.xlu1 %v847_v3  ;;  %761 = vmatpush3.bf16.msra.mxu0 %v758_v27 }
  0x29   :  { %178 = vperm.xlu1 %790, %v112_v14   ;;  %763 = vmatprep.subr.bf16.mxu0 %v762_v35 }
  0x2a   :  { %773 = vmatpush3.bf16.msra.mxu1 %v762_v35 }
  0x2b   :  { %152 = vperm.xlu0 %789, %v117_v17  }
  0x2c   :  { %765 = vmatpush3.bf16.msra.mxu0 %v762_v35 }
  0x2d   :  { %190 = vperm.xlu1 %790, %v115_v15  }
  0x2f   :  { %157 = vperm.xlu0 %789, %v118_v18  }
  0x31   :  { %194 = vperm.xlu1 %790, %v116_v16  }
  0x33   :  { %791 = vset.pattern.permute.xlu0 %v847_v3  ;;  %v537_v3 = vrot.slane %v519_v59, %v536_v0 }
  0x35   :  { %198 = vperm.xlu1 %790, %v117_v17  }
  0x39   :  { %202 = vperm.xlu1 %790, %v118_v18  }
  0x95   :  { %v138_v13 = vpop.permute.xlu1 %137  ;;  %v183_v15 = vpop.permute.xlu0 %182 }
  0x96   :  { %v211_v32 = vmul.f32 %v673_v24, %v183_v15  ;;  %v167_v35 = vmul.f32 %v672_v23, %v138_v13 }
  0x99   :  { %v175_v17 = vpop.permute.xlu0 %174 }
  0x9a   :  { %v187_v14 = vpop.permute.xlu1 %186  ;;  %v209_v28 = vmul.f32 %v673_v24, %v175_v17 }
  0x9e   :  { %v133_v19 = vpop.permute.xlu0 %132 }
  0x9f   :  { %v123_v16 = vpop.permute.xlu1 %122  ;;  %v166_v34 = vmul.f32 %v672_v23, %v133_v19 }
  0xa0   :  { %v164_v27 = vmul.f32 %v672_v23, %v123_v16 }
  0xa2   :  { %v143_v21 = vpop.permute.xlu0 %142  ;;  %v217_v33 = vadd.f32 %v209_v28, %v164_v27 }
  0xa3   :  { %v128_v18 = vpop.permute.xlu1 %127 }
  0xa4   :  { %v165_v29 = vmul.f32 %v672_v23, %v128_v18 }
  0xa6   :  { %v148_v25 = vpop.permute.xlu0 %147 }
  0xa8   :  { %v179_v20 = vpop.permute.xlu1 %178 }
  0xa9   :  { %v210_v30 = vmul.f32 %v673_v24, %v179_v20 }
  0xaa   :  { %v153_v31 = vpop.permute.xlu0 %152 }
  0xac   :  { %v191_v22 = vpop.permute.xlu1 %190 }
  0xb0   :  { %v195_v26 = vpop.permute.xlu1 %194 }
  0xf1   :  { %v918_v37 = vpop.f32.mrb[0].mxu0 }
  0xf2   :  { %v715_v38 = vpop.f32.mrb[1].mxu0  ;;  %v254_v39 = vrot.slane %v918_v37, %v253_v36  ;;  %v247_v41 = vcombine.high %v918_v37, %v918_v37 }
  0xf3   :  { %v199_v38 = vpop.permute.xlu1 %198 }
  0xf4   :  { %v270_v42 = vrot.slane %v254_v39, %v253_v36  ;;  %v262_v43 = vcombine.high %v254_v39, %v254_v39  ;;  %v261_v44 = vrot.slane %v247_v41, %v253_v36  ;;  %v674_v39 = vld [vmem:[#allocation2 + $0x62] ss:$0 sm:$0xff]  ;;  %v168_v41 = vmul.f32 %v672_v23, %v143_v21 }
  0xf6   :  { %v299_v45 = vrot.slane %v270_v42, %v298_v40  ;;  %v284_v46 = vrot.slane %v262_v43, %v253_v36  ;;  %v292_v47 = vcombine.high %v270_v42, %v270_v42  ;;  %v263_v50 = vcombine.high %v261_v44, %v261_v44 }
  0xf7   :  { %v277_v52 = vrot.slane %v261_v44, %v253_v36  ;;  %v213_v42 = vmul.f32 %v673_v24, %v191_v22  ;;  %v219_v43 = vadd.f32 %v211_v32, %v166_v34  ;;  %v230_v44 = vadd.f32 %v674_v39, %v217_v33 }
  0xf8   :  { %328 = vrot.lane.b32.xlu0 %v299_v45, %s849_s0  ;;  %v303_v48 = vrot.slane %v284_v46, %v298_v40  ;;  %v294_v49 = vcombine.high %v284_v46, %v284_v46  ;;  %v307_v51 = vrot.slane %v292_v47, %v298_v40  ;;  %v291_v54 = vrot.slane %v263_v50, %v253_v36 }
  0xf9   :  { %v315_v55 = vrot.slane %v277_v52, %v298_v40  ;;  %v293_v56 = vcombine.high %v277_v52, %v277_v52  ;;  %v212_v36 = vmul.f32 %v673_v24, %v187_v14  ;;  %v169_v46 = vmul.f32 %v672_v23, %v148_v25 }
  0xfa   :  { %330 = vrot.lane.b32.xlu1 %v303_v48, %s849_s0  ;;  %v311_v53 = vrot.slane %v294_v49, %v298_v40  ;;  %v319_v57 = vrot.slane %v291_v54, %v298_v40  ;;  %v295_v58 = vcombine.high %v291_v54, %v291_v54  ;;  %v214_v47 = vmul.f32 %v673_v24, %v195_v26  ;;  %v158_v48 = vpop.permute.xlu0 %157 }
  0xfb   :  { %v323_v60 = vrot.slane %v293_v56, %v298_v40  ;;  %v220_v45 = vadd.f32 %v212_v36, %v167_v35  ;;  %v221_v50 = vadd.f32 %v213_v42, %v168_v41  ;;  %v170_v52 = vmul.f32 %v672_v23, %v153_v31  ;;  %v675_v35 = vld [vmem:[#allocation2 + $0x63] ss:$0 sm:$0xff] }
  0xfc   :  { %332 = vrot.lane.b32.xlu0 %v307_v51, %s849_s0  ;;  %v327_v62 = vrot.slane %v295_v58, %v298_v40  ;;  %v218_v40 = vadd.f32 %v210_v30, %v165_v29  ;;  %v203_v51 = vpop.permute.xlu1 %202  ;;  %v238_v54 = vadd.f32 %v230_v44, %v918_v37  ;;  %v222_v56 = vadd.f32 %v214_v47, %v169_v46 }
  0xfd   :  { %v233_v58 = vadd.f32 %v674_v39, %v220_v45  ;;  %v171_v59 = vmul.f32 %v672_v23, %v158_v48  ;;  %v234_v0 = vadd.f32 %v674_v39, %v221_v50 }
  0xfe   :  { %334 = vrot.lane.b32.xlu1 %v311_v53, %s849_s0  ;;  %v231_v49 = vadd.f32 %v674_v39, %v218_v40  ;;  %v215_v53 = vmul.f32 %v673_v24, %v199_v38  ;;  %v235_v6 = vadd.f32 %v674_v39, %v222_v56 }
  0xff   :  { %v241_v10 = vadd.f32 %v233_v58, %v918_v37  ;;  %v242_v14 = vadd.f32 %v234_v0, %v918_v37 }
 0x100   :  { %336 = vrot.lane.b32.xlu0 %v315_v55, %s849_s0  ;;  %v232_v55 = vadd.f32 %v674_v39, %v219_v43  ;;  %v243_v19 = vadd.f32 %v235_v6, %v918_v37 }
 0x102   :  { %338 = vrot.lane.b32.xlu1 %v319_v57, %s849_s0  ;;  %v240_v4 = vadd.f32 %v232_v55, %v918_v37 }
 0x104   :  { %340 = vrot.lane.b32.xlu0 %v323_v60, %s849_s0  ;;  %v216_v60 = vmul.f32 %v673_v24, %v203_v51 }
 0x106   :  { %342 = vrot.lane.b32.xlu1 %v327_v62, %s849_s0  ;;  %v239_v62 = vadd.f32 %v231_v49, %v918_v37 }
 0x108   :  { %525 = vbcast.lane.b32.xlu0 %v523_v63, 256 }
 0x10a   :  { %532 = vbcast.lane.b32.xlu1 %v530_v1, 256  ;;  %v223_v1 = vadd.f32 %v215_v53, %v170_v52 }
 0x10c   :  { %539 = vbcast.lane.b32.xlu0 %v537_v3, 256  ;;  %v236_v15 = vadd.f32 %v674_v39, %v223_v1 }
 0x10e   :  { %546 = vbcast.lane.b32.xlu1 %v544_v5, 256  ;;  %v244_v24 = vadd.f32 %v236_v15, %v918_v37 }
 0x110   :  { %553 = vbcast.lane.b32.xlu0 %v551_v7, 256  ;;  %v224_v7 = vadd.f32 %v216_v60, %v171_v59 }
 0x112   :  { %560 = vbcast.lane.b32.xlu1 %v558_v9, 256  ;;  %v237_v20 = vadd.f32 %v674_v39, %v224_v7 }
 0x114   :  { %567 = vbcast.lane.b32.xlu0 %v565_v11, 256  ;;  %v245_v28 = vadd.f32 %v237_v20, %v918_v37 }
 0x116   :  { %574 = vbcast.lane.b32.xlu1 %v572_v12, 256 }
 0x16a   :  { %v329_v57 = vpop.permute.xlu0 %328 }
 0x16b   :  { %v352_v61 = vadd.f32 %v329_v57, %v238_v54 }
 0x16c   :  { %v331_v63 = vpop.permute.xlu1 %330 }
 0x16d   :  { %v360_v2 = vmax.f32 %v352_v61, 0.0  ;;  %v353_v3 = vadd.f32 %v331_v63, %v239_v62 }
 0x16e   :  { %v333_v5 = vpop.permute.xlu0 %332 }
 0x16f   :  { %v361_v8 = vmax.f32 %v353_v3, 0.0  ;;  %v354_v9 = vadd.f32 %v333_v5, %v240_v4  ;;  %732 = vmatprep.mubr.msk.f32.mxu0 %vm381_vm2, %v360_v2 }
 0x170   :  { %v335_v11 = vpop.permute.xlu1 %334 }
 0x171   :  { %v362_v12 = vmax.f32 %v354_v9, 0.0  ;;  %v355_v13 = vadd.f32 %v335_v11, %v241_v10  ;;  %733 = vmatmul.mubr.msk.f32.vlgmr.msra.gmra.mrb[2].mxu0 %vm381_vm2, %v361_v8 }
 0x172   :  { %v337_v16 = vpop.permute.xlu0 %336 }
 0x173   :  { %v363_v17 = vmax.f32 %v355_v13, 0.0  ;;  %v356_v18 = vadd.f32 %v337_v16, %v242_v14  ;;  %735 = vmatprep.mubr.msk.f32.mxu1 %vm381_vm2, %v362_v12 }
 0x174   :  { %v339_v21 = vpop.permute.xlu1 %338 }
 0x175   :  { %v364_v22 = vmax.f32 %v356_v18, 0.0  ;;  %v357_v23 = vadd.f32 %v339_v21, %v243_v19  ;;  %736 = vmatmul.mubr.msk.f32.vlgmr.msra.gmra.mrb[0].mxu1 %vm381_vm2, %v363_v17 }
 0x176   :  { %v341_v25 = vpop.permute.xlu0 %340 }
 0x177   :  { %v365_v26 = vmax.f32 %v357_v23, 0.0  ;;  %v358_v27 = vadd.f32 %v341_v25, %v244_v24  ;;  %738 = vmatprep.mubr.msk.f32.mxu1 %vm381_vm2, %v364_v22 }
 0x178   :  { %v343_v29 = vpop.permute.xlu1 %342 }
 0x179   :  { %v366_v30 = vmax.f32 %v358_v27, 0.0  ;;  %v359_v31 = vadd.f32 %v343_v29, %v245_v28  ;;  %739 = vmatmul.mubr.msk.f32.gmra.mrb[2].mxu1 %vm381_vm2, %v365_v26 }
 0x17a   :  { %v526_v34 = vpop.permute.xlu0 %525 }
 0x17b   :  { %v367_v32 = vmax.f32 %v359_v31, 0.0  ;;  %741 = vmatprep.mubr.msk.f32.mxu1 %vm381_vm2, %v366_v30 }
 0x17c   :  { %v533_v33 = vpop.permute.xlu1 %532 }
 0x17d   :  { %742 = vmatmul.mubr.msk.f32.gmra.mrb[4].mxu1 %vm381_vm2, %v367_v32 }
 0x17e   :  { %v540_v37 = vpop.permute.xlu0 %539 }
 0x180   :  { %v547_v41 = vpop.permute.xlu1 %546 }
 0x182   :  { %v554_v60 = vpop.permute.xlu0 %553 }
 0x184   :  { %v561_v55 = vpop.permute.xlu1 %560 }
 0x186   :  { %v568_v21 = vpop.permute.xlu0 %567 }
 0x188   :  { %v575_v16 = vpop.permute.xlu1 %574 }
 0x244   :  { %v734_v36 = vpop.f32.mrb[2].mxu0 }
 0x245   :  { %v478_v38 = vadd.f32 %v734_v36, %v675_v35  ;;  %v472_v39 = vpop.f32.mrb[3].mxu0 }
 0x246   :  { %v473_v40 = vadd.f32 %v675_v35, %v472_v39 }
 0x247   :  { %v512_v42 = vmax.f32 %v478_v38, 0.0 }
 0x248   :  { %v511_v43 = vmax.f32 %v473_v40, 0.0  ;;  %v737_v44 = vpop.f32.mrb[0].mxu1 }
 0x249   :  { %v577_v45 = vmul.f32 %v533_v33, %v512_v42  ;;  %v488_v46 = vadd.f32 %v737_v44, %v675_v35  ;;  %v482_v47 = vpop.f32.mrb[1].mxu1 }
 0x24a   :  { %v576_v48 = vmul.f32 %v526_v34, %v511_v43  ;;  %v483_v49 = vadd.f32 %v675_v35, %v482_v47 }
 0x24b   :  { %v590_v50 = vrot.slane %v577_v45, 4  ;;  %v514_v51 = vmax.f32 %v488_v46, 0.0 }
 0x24c   :  { %v584_v52 = vrot.slane %v576_v48, 4  ;;  %v513_v53 = vmax.f32 %v483_v49, 0.0  ;;  %v740_v54 = vpop.f32.mrb[2].mxu1 }
 0x24d   :  { %v591_v56 = vmax.f32 %v577_v45, %v590_v50  ;;  %v579_v57 = vmul.f32 %v547_v41, %v514_v51  ;;  %v498_v58 = vadd.f32 %v740_v54, %v675_v35  ;;  %v492_v59 = vpop.f32.mrb[3].mxu1 }
 0x24e   :  { %v585_v61 = vmax.f32 %v576_v48, %v584_v52  ;;  %v578_v62 = vmul.f32 %v540_v37, %v513_v53  ;;  %v493_v63 = vadd.f32 %v675_v35, %v492_v59 }
 0x24f   :  { %v592_v0 = vrot.slane %v591_v56, 2  ;;  %v602_v1 = vrot.slane %v579_v57, 4  ;;  %v516_v2 = vmax.f32 %v498_v58, 0.0 }
 0x250   :  { %v586_v3 = vrot.slane %v585_v61, 2  ;;  %v596_v4 = vrot.slane %v578_v62, 4  ;;  %v515_v5 = vmax.f32 %v493_v63, 0.0  ;;  %v743_v6 = vpop.f32.mrb[4].mxu1 }
 0x251   :  { %v593_v7 = vmax.f32 %v591_v56, %v592_v0  ;;  %v603_v8 = vmax.f32 %v579_v57, %v602_v1  ;;  %v581_v9 = vmul.f32 %v561_v55, %v516_v2  ;;  %v508_v10 = vadd.f32 %v743_v6, %v675_v35  ;;  %v502_v11 = vpop.f32.mrb[5].mxu1 }
 0x252   :  { %v587_v12 = vmax.f32 %v585_v61, %v586_v3  ;;  %v597_v13 = vmax.f32 %v578_v62, %v596_v4  ;;  %v580_v14 = vmul.f32 %v554_v60, %v515_v5  ;;  %v503_v15 = vadd.f32 %v675_v35, %v502_v11 }
 0x253   :  { %v594_v17 = vrot.slane %v593_v7, 1  ;;  %v604_v18 = vrot.slane %v603_v8, 2  ;;  %v614_v19 = vrot.slane %v581_v9, 4  ;;  %v518_v20 = vmax.f32 %v508_v10, 0.0 }
 0x254   :  { %v588_v22 = vrot.slane %v587_v12, 1  ;;  %v598_v23 = vrot.slane %v597_v13, 2  ;;  %v608_v24 = vrot.slane %v580_v14, 4  ;;  %v517_v25 = vmax.f32 %v503_v15, 0.0 }
 0x255   :  { %v595_v26 = vmax.f32 %v593_v7, %v594_v17  ;;  %v605_v27 = vmax.f32 %v603_v8, %v604_v18  ;;  %v615_v28 = vmax.f32 %v581_v9, %v614_v19  ;;  %v583_v29 = vmul.f32 %v575_v16, %v518_v20 }
 0x256   :  { %v589_v30 = vmax.f32 %v587_v12, %v588_v22  ;;  %v599_v31 = vmax.f32 %v597_v13, %v598_v23  ;;  %v609_v32 = vmax.f32 %v580_v14, %v608_v24  ;;  %v582_v33 = vmul.f32 %v568_v21, %v517_v25 }
 0x257   :  { %v606_v34 = vrot.slane %v605_v27, 1  ;;  %v616_v35 = vrot.slane %v615_v28, 2  ;;  %v626_v36 = vrot.slane %v583_v29, 4 }
 0x258   :  { %v641_v38 = vsel %vm640_vm3, %v595_v26, %v589_v30  ;;  %v600_v39 = vrot.slane %v599_v31, 1  ;;  %v610_v40 = vrot.slane %v609_v32, 2  ;;  %v620_v41 = vrot.slane %v582_v33, 4 }
 0x259   :  { %v617_v42 = vmax.f32 %v615_v28, %v616_v35  ;;  %v627_v37 = vmax.f32 %v583_v29, %v626_v36  ;;  %v607_v46 = vmax.f32 %v605_v27, %v606_v34 }
 0x25a   :  { %v601_v43 = vmax.f32 %v599_v31, %v600_v39  ;;  %v611_v44 = vmax.f32 %v609_v32, %v610_v40  ;;  %v621_v45 = vmax.f32 %v582_v33, %v620_v41 }
 0x25b   :  { %v618_v47 = vrot.slane %v617_v42, 1  ;;  %v628_v48 = vrot.slane %v627_v37, 2 }
 0x25c   :  { %v643_v49 = vsel %vm642_vm4, %v601_v43, %v641_v38  ;;  %v612_v50 = vrot.slane %v611_v44, 1  ;;  %v622_v51 = vrot.slane %v621_v45, 2 }
 0x25d   :  { %v629_v52 = vmax.f32 %v627_v37, %v628_v48  ;;  %v645_v53 = vsel %vm644_vm5, %v607_v46, %v643_v49  ;;  %v619_v56 = vmax.f32 %v617_v42, %v618_v47 }
 0x25e   :  { %v613_v54 = vmax.f32 %v611_v44, %v612_v50  ;;  %v623_v55 = vmax.f32 %v621_v45, %v622_v51 }
 0x25f   :  { %v630_v57 = vrot.slane %v629_v52, 1 }
 0x260   :  { %v624_v58 = vrot.slane %v623_v55, 1  ;;  %v647_v59 = vsel %vm646_vm6, %v613_v54, %v645_v53 }
 0x261   :  { %v649_v60 = vsel %vm648_vm7, %v619_v56, %v647_v59  ;;  %v631_v62 = vmax.f32 %v629_v52, %v630_v57 }
 0x262   :  { %v625_v61 = vmax.f32 %v623_v55, %v624_v58 }
 0x264   :  { %v651_v63 = vsel %vm650_vm8, %v625_v61, %v649_v60 }
 0x265   :  { %v653_v0 = vsel %vm652_vm9, %v631_v62, %v651_v63 }
 0x266   :  { %655 = vst [vmem:[#allocation5] sm:$0xff] %v653_v0 }
 0x267   :  { %825 = shalt.err (!%p822_p12)
}
 0x268   :  { %s826_s25 = scalar_lea.hbm %s967_s4, 128 }
 0x269   :  { %p827_p13 = scmp.ne.s32.totalorder %s967_s4, %s826_s25  ;;  %p830_p0 = scmp.lt.u32.totalorder %s826_s25, %s967_s4 }
 0x26b   :  { %p832_p1 = pnand %p830_p0, %p827_p13 }
 0x26d   :  { %835 = shalt.err (!%p832_p1)
}
 0x26e   :  { %665 = dma.vmem_to_hbm [thread:$0]  %s663_s21, 128, %s967_s4, [#allocation4]  }
 0x26f   :  { %838 = dma.done.wait [#allocation4], 128  }
 0x270   :  { %839 = vsyncadd [#allocation4], 4294967168 }
 0x271   :  { %669 = vsyncpa [#allocation3], 1 }
 0x272   :  { %670 = vsyncpa [#allocation4], 1 }

</bundles_post_ra>
